<compile_context>
chip_gen: v5e
topology: v5e:2x2
jax: 0.10.0
libtpu: 0.0.40
codegen_flags: <defaults>
</compile_context>

<pallas_src>
import jax
import jax.numpy as jnp
from jax.experimental import pallas as pl
from jax.experimental.pallas import tpu as pltpu


# Scoped-VMEM limit: well above the default 16/32 MiB, below v7x's 64 MiB
# physical per-TensorCore budget.
_VMEM_LIMIT_BYTES = 48 * 1024 * 1024


# ---------------------------------------------------------------------------
# Embedding kernel: one-hot matmul, single grid step (f32 -> exact table rows).
# ---------------------------------------------------------------------------
def _embedding_kernel(ids_ref, table_ref, out_ref):
    # ids_ref: (N, 1) int32, table_ref: (V, H), out_ref: (N, H)
    ids = ids_ref[...]
    n = ids.shape[0]
    v = table_ref.shape[0]
    col = jax.lax.broadcasted_iota(jnp.int32, (n, v), 1)
    onehot = (col == ids).astype(jnp.float32)                      # (N, V)
    out_ref[...] = jnp.dot(onehot, table_ref[...],
                           preferred_element_type=jnp.float32).astype(out_ref.dtype)


def embedding_pallas(ids_flat, table):
    # TODO(synk): for vocabularies beyond a few thousand, tile over
    # (N 'parallel', V 'arbitrary') with an f32 accumulator or switch to a
    # scalar-prefetch row-gather BlockSpec (bounds VMEM on v7x, removes wasted
    # MXU work).  V=50 here, so one matmul is the cheapest correct option.
    n = ids_flat.shape[0]
    v, h = table.shape
    ids2 = ids_flat.reshape(n, 1).astype(jnp.int32)
    return pl.pallas_call(
        _embedding_kernel,
        out_shape=jax.ShapeDtypeStruct((n, h), table.dtype),
        grid_spec=pltpu.PrefetchScalarGridSpec(
            num_scalar_prefetch=0,
            grid=(1,),
            in_specs=[
                pl.BlockSpec((n, 1), lambda i: (0, 0)),
                pl.BlockSpec((v, h), lambda i: (0, 0)),
            ],
            out_specs=pl.BlockSpec((n, h), lambda i: (0, 0)),
        ),
        compiler_params=pltpu.CompilerParams(
            dimension_semantics=("arbitrary",),
            vmem_limit_bytes=_VMEM_LIMIT_BYTES),
    )(ids2, table)


# ---------------------------------------------------------------------------
# Bidirectional GRU layer kernel: one grid step per direction (megacore on v7x).
# ---------------------------------------------------------------------------
def _bigru_dir_kernel(x_ref, wi_ref, wh_ref, bi_ref, bhn_ref, out_ref, hn_ref, gi_ref):
    # program_id(0): 0 = forward direction, 1 = time-reversed direction.
    #   x_ref  : (N, Fin) f32    flattened (T*B, Fin) layer input (shared by both dirs)
    #   wi_ref : (1, Fin, 3H) bf16  fused input->gate weights, gate order r|z|n
    #   wh_ref : (1, H, 3H)   bf16  fused hidden->gate weights
    #   bi_ref : (1, 1, 3H)   f32   fused biases [b_ir+b_hr | b_iz+b_hz | b_in]
    #   bhn_ref: (1, 1, H)    f32   b_hn (stays inside the r * (.) term, per PyTorch GRU)
    #   out_ref: (1, T, B, H) f32   per-direction hidden state for every timestep
    #   hn_ref : (1, B, H)    f32   final hidden state of this direction
    #   gi_ref : (N, 3H) f32 VMEM   scratch for the fused input projections
    d = pl.program_id(0)
    t_len = out_ref.shape[1]
    b = out_ref.shape[2]
    h_dim = out_ref.shape[3]

    # Fused input projection for ALL timesteps and ALL gates: one MXU matmul,
    # bf16 operands, f32 accumulation, batch folded into the matmul M dim.
    # TODO(synk): for production shapes with B % 8 != 0, re-layout this scratch
    # as (T, B, 3H) + leading-axis indexing (needs an in-kernel (N,3H)->(T,B,3H)
    # relayout); with B a multiple of 8 the flat per-step slices below are
    # already sublane-aligned.
    # TODO(synk): for T*B*H beyond ~1.5M elements, T-chunk this precompute and
    # the output writeback (extra grid axis) to fit v7x's 64 MiB VMEM.
    x_bf = x_ref[...].astype(jnp.bfloat16)
    gi_ref[...] = (jnp.dot(x_bf, wi_ref[0], preferred_element_type=jnp.float32)
                   + bi_ref[0])

    w_h = wh_ref[0]                                      # (H, 3H) bf16, hoisted
    b_hn = bhn_ref[0]                                    # (1, H) f32, hoisted
    reverse = d == 1

    def step(i, h_prev):
        t = jnp.where(reverse, t_len - 1 - i, i)
        g = gi_ref[pl.ds(t * b, b), :]                   # (B, 3H) precomputed gi
        # Single fused (B,H)@(H,3H) recurrence matmul, split with static slices.
        hh = jnp.dot(h_prev.astype(jnp.bfloat16), w_h,
                     preferred_element_type=jnp.float32)  # (B, 3H)
        r = jax.nn.sigmoid(g[:, :h_dim] + hh[:, :h_dim])
        z = jax.nn.sigmoid(g[:, h_dim:2 * h_dim] + hh[:, h_dim:2 * h_dim])
        c = jnp.tanh(g[:, 2 * h_dim:] + r * (hh[:, 2 * h_dim:] + b_hn))
        h_new = (1.0 - z) * c + z * h_prev
        # Note: at H=32, B=2 this store is a masked partial vst; it vanishes for
        # production H >= 128 (lane-dense rows).
        out_ref[0, t] = h_new.astype(out_ref.dtype)
        return h_new

    # unroll=2 lets the LLO scheduler overlap stores / gi loads / VPU gate math
    # with the next step's MXU chain.
    h_last = jax.lax.fori_loop(0, t_len, step,
                               jnp.zeros((b, h_dim), jnp.float32), unroll=2)
    hn_ref[0] = h_last.astype(hn_ref.dtype)


def bigru_layer_pallas(x2, t_len, batch, wi, wh, bi, bhn):
    # TODO(synk): on single-TC chips (v5e/v6e) fold both directions into one
    # grid step and batch the recurrence as a (2B,H)@(H,3H) matmul; the 2-step
    # "parallel" grid below is the right shape for v7x megacore.
    n_rows, f_in = x2.shape
    h_dim = wh.shape[1]
    out, hn = pl.pallas_call(
        _bigru_dir_kernel,
        out_shape=(
            jax.ShapeDtypeStruct((2, t_len, batch, h_dim), jnp.float32),
            jax.ShapeDtypeStruct((2, batch, h_dim), jnp.float32),
        ),
        grid_spec=pltpu.PrefetchScalarGridSpec(
            num_scalar_prefetch=0,
            grid=(2,),
            in_specs=[
                # x2's block index never changes across the grid, so it stays
                # resident (no per-step re-DMA).
                pl.BlockSpec((n_rows, f_in), lambda d: (0, 0)),
                pl.BlockSpec((1, f_in, 3 * h_dim), lambda d: (d, 0, 0)),
                pl.BlockSpec((1, h_dim, 3 * h_dim), lambda d: (d, 0, 0)),
                pl.BlockSpec((1, 1, 3 * h_dim), lambda d: (d, 0, 0)),
                pl.BlockSpec((1, 1, h_dim), lambda d: (d, 0, 0)),
            ],
            out_specs=(
                pl.BlockSpec((1, t_len, batch, h_dim), lambda d: (d, 0, 0, 0)),
                pl.BlockSpec((1, batch, h_dim), lambda d: (d, 0, 0)),
            ),
            scratch_shapes=[pltpu.VMEM((n_rows, 3 * h_dim), jnp.float32)],
        ),
        compiler_params=pltpu.CompilerParams(
            dimension_semantics=("parallel",),
            vmem_limit_bytes=_VMEM_LIMIT_BYTES),
    )(x2, wi, wh, bi, bhn)
    return out, hn


# ---------------------------------------------------------------------------
# Wrapper: parameter packing (PyTorch layout -> fused kernel layout) + Encoder.
# ---------------------------------------------------------------------------
def _pack_direction(w_ih, w_hh, b_ih, b_hh, h):
    """PyTorch GRU weights (3H,Fin)/(3H,H)/(3H,)/(3H,), gate order [r,z,n]."""
    wi = w_ih.T.astype(jnp.bfloat16)                                  # (Fin, 3H)
    wh = w_hh.T.astype(jnp.bfloat16)                                  # (H, 3H)
    # Fused bias: r and z get b_ih+b_hh; n keeps only b_in here (b_hn is applied
    # inside the r * (.) term in-kernel, matching torch.nn.GRU).  Kept in f32.
    bi = jnp.concatenate([b_ih[:2 * h] + b_hh[:2 * h], b_ih[2 * h:]]).reshape(1, 3 * h)
    bhn = b_hh[2 * h:].reshape(1, h)                                  # (1, H)
    return wi, wh, bi, bhn


def pack_layer(params_fwd, params_bwd, h):
    packs = [_pack_direction(*params_fwd, h), _pack_direction(*params_bwd, h)]
    wi, wh, bi, bhn = (jnp.stack(t) for t in zip(*packs))
    return wi, wh, bi, bhn       # (2,Fin,3H) bf16, (2,H,3H) bf16, (2,1,3H) f32, (2,1,H) f32


def encoder_pallas(x_ids, emb_table, layer_params):
    """x_ids: (T, B) int32 -> (h: (T, B, 2H), states: (2*num_layers, B, H))."""
    t_len, batch = x_ids.shape
    h_dim = emb_table.shape[1]
    x2 = embedding_pallas(x_ids.reshape(-1), emb_table)               # (T*B, H) f32
    states = []
    h_seq = None
    for (wi, wh, bi, bhn) in layer_params:
        out, hn = bigru_layer_pallas(x2, t_len, batch, wi, wh, bi, bhn)
        states.append(hn)
        # TODO(synk): for production H (multiple of 128) write both directions
        # straight into an interleaved (T, B, 2H) output (per-direction block
        # (T, B, H), index (0, 0, d)) and drop this concat; at H=32 that block's
        # last dim is not a 128 multiple, so the safe (2,T,B,H) layout + one
        # concat per layer is kept here.
        h_seq = jnp.concatenate([out[0], out[1]], axis=-1)            # (T, B, 2H)
        x2 = h_seq.reshape(t_len * batch, 2 * h_dim)                  # free view
    return h_seq, jnp.concatenate(states, axis=0)


# ---------------------------------------------------------------------------
# Pure-JAX reference (mirrors torch.nn.Embedding + bidirectional nn.GRU).
# matmul_dtype=float32  -> torch-faithful reference.
# matmul_dtype=bfloat16 -> same bf16-operand / f32-accumulate MXU numerics as
#                          the kernel (tight implementation check).
# ---------------------------------------------------------------------------
def encoder_reference(x_ids, emb_table, raw_params, matmul_dtype=jnp.float32):
    prec = jax.lax.Precision.HIGHEST if matmul_dtype == jnp.float32 else None

    def mm(a, b):
        return jnp.dot(a.astype(matmul_dtype), b.astype(matmul_dtype),
                       preferred_element_type=jnp.float32, precision=prec)

    x = emb_table[x_ids]                                              # (T, B, H)
    t_len, batch, h_dim = x.shape

    def cell(x_t, h, w_ih, w_hh, b_ih, b_hh):
        gi = mm(x_t, w_ih.T) + b_ih
        gh = mm(h, w_hh.T) + b_hh
        r = jax.nn.sigmoid(gi[:, :h_dim] + gh[:, :h_dim])
        z = jax.nn.sigmoid(gi[:, h_dim:2 * h_dim] + gh[:, h_dim:2 * h_dim])
        n = jnp.tanh(gi[:, 2 * h_dim:] + r * gh[:, 2 * h_dim:])
        return (1.0 - z) * n + z * h

    inp = x
    states = []
    for (p_fwd, p_bwd) in raw_params:
        h = jnp.zeros((batch, h_dim), jnp.float32)
        fwd = []
        for t in range(t_len):
            h = cell(inp[t], h, *p_fwd)
            fwd.append(h)
        states.append(h)
        h = jnp.zeros((batch, h_dim), jnp.float32)
        bwd = [None] * t_len
        for t in range(t_len - 1, -1, -1):
            h = cell(inp[t], h, *p_bwd)
            bwd[t] = h
        states.append(h)
        inp = jnp.concatenate([jnp.stack(fwd), jnp.stack(bwd)], axis=-1)
    return inp, jnp.stack(states)


if __name__ == "__main__":
    input_dim = 50          # vocabulary size
    hidden_dim = 32
    num_layers = 2
    seq_len = 8
    batch = 2

    key = jax.random.PRNGKey(0)
    k_emb, k_ids, k_w = jax.random.split(key, 3)

    emb_table = jax.random.normal(k_emb, (input_dim, hidden_dim), dtype=jnp.float32)
    x_ids = jax.random.randint(k_ids, (seq_len, batch), 0, input_dim, dtype=jnp.int32)

    # Deterministic GRU parameters in PyTorch layout: per layer, per direction
    # (w_ih (3H,Fin), w_hh (3H,H), b_ih (3H,), b_hh (3H,)); gate order [r, z, n].
    # (xavier/orthogonal init of the original module only changes values, not
    #  forward semantics, so scaled-normal init is used here.)
    scale = 1.0 / (hidden_dim ** 0.5)
    raw_params = []
    for layer in range(num_layers):
        f_in = hidden_dim if layer == 0 else 2 * hidden_dim
        dirs = []
        for _ in range(2):
            k_w, k1, k2, k3, k4 = jax.random.split(k_w, 5)
            w_ih = scale * jax.random.normal(k1, (3 * hidden_dim, f_in), dtype=jnp.float32)
            w_hh = scale * jax.random.normal(k2, (3 * hidden_dim, hidden_dim), dtype=jnp.float32)
            b_ih = scale * jax.random.normal(k3, (3 * hidden_dim,), dtype=jnp.float32)
            b_hh = scale * jax.random.normal(k4, (3 * hidden_dim,), dtype=jnp.float32)
            dirs.append((w_ih, w_hh, b_ih, b_hh))
        raw_params.append(tuple(dirs))

    layer_params = [pack_layer(p_fwd, p_bwd, hidden_dim) for (p_fwd, p_bwd) in raw_params]

    h_out, states = encoder_pallas(x_ids, emb_table, layer_params)
    h_out, states = jax.block_until_ready((h_out, states))

    assert h_out.shape == (seq_len, batch, 2 * hidden_dim)
    assert states.shape == (2 * num_layers, batch, hidden_dim)

    # (a) Implementation check: reference with the SAME bf16 MXU-operand numerics.
    h_bf, s_bf = encoder_reference(x_ids, emb_table, raw_params, matmul_dtype=jnp.bfloat16)
    err_h = float(jnp.max(jnp.abs(h_out - h_bf)))
    err_s = float(jnp.max(jnp.abs(states - s_bf)))
    assert jnp.allclose(h_out, h_bf, atol=5e-3, rtol=5e-3), f"impl err h={err_h}"
    assert jnp.allclose(states, s_bf, atol=5e-3, rtol=5e-3), f"impl err s={err_s}"

    # (b) Fidelity check vs the exact f32 (torch-faithful) reference; divergence
    #     is bf16 operand rounding only.
    h_f32, s_f32 = encoder_reference(x_ids, emb_table, raw_params, matmul_dtype=jnp.float32)
    err_h32 = float(jnp.max(jnp.abs(h_out - h_f32)))
    err_s32 = float(jnp.max(jnp.abs(states - s_f32)))
    assert jnp.allclose(h_out, h_f32, atol=5e-2, rtol=5e-2), f"fidelity err h={err_h32}"
    assert jnp.allclose(states, s_f32, atol=5e-2, rtol=5e-2), f"fidelity err s={err_s32}"

    print("KERNEL_OK")
</pallas_src>

<mosaic_0001>
module attributes {stable_mosaic.version = 11 : i64} {
  func.func @_embedding_kernel(%arg0: i32, %arg1: memref<16x1xi32, #tpu.memory_space<vmem>>, %arg2: memref<50x32xf32, #tpu.memory_space<vmem>>, %arg3: memref<16x32xf32, #tpu.memory_space<vmem>>) attributes {dimension_semantics = [#tpu.dimension_semantics<arbitrary>], iteration_bounds = array<i64: 1>, scalar_prefetch = 0 : i64, scratch_operands = 0 : i64, tpu.core_type = #tpu.core_type<tc>, window_params = [{pipeline_mode = #tpu.pipeline_mode<synchronous>, transform_indices = @transform_0, window_bounds = array<i64: 16, 1>}, {pipeline_mode = #tpu.pipeline_mode<synchronous>, transform_indices = @transform_1, window_bounds = array<i64: 50, 32>}, {pipeline_mode = #tpu.pipeline_mode<synchronous>, transform_indices = @transform_2, window_bounds = array<i64: 16, 32>}]} {
    %c0 = arith.constant 0 : index
    %c0_0 = arith.constant 0 : index
    %0 = vector.load %arg1[%c0, %c0_0] : memref<16x1xi32, #tpu.memory_space<vmem>>, vector<16x1xi32>
    %1 = tpu.iota {dimensions = array<i32: 1>} : vector<16x50xi32>
    %2 = vector.broadcast %0 : vector<16x1xi32> to vector<16x50xi32>
    %3 = arith.cmpi eq, %1, %2 : vector<16x50xi32>
    %4 = arith.extui %3 : vector<16x50xi1> to vector<16x50xi32>
    %5 = arith.sitofp %4 : vector<16x50xi32> to vector<16x50xf32>
    %c0_1 = arith.constant 0 : index
    %c0_2 = arith.constant 0 : index
    %6 = vector.load %arg2[%c0_1, %c0_2] : memref<50x32xf32, #tpu.memory_space<vmem>>, vector<50x32xf32>
    %cst = arith.constant dense<0.000000e+00> : vector<16x32xf32>
    %7 = tpu.matmul %5, %6, %cst {dimension_numbers = #tpu.dot_dimension_numbers<[1], [0], [0], [1], [0, 0, 1, 1], [], []>} : vector<16x50xf32>, vector<50x32xf32>, vector<16x32xf32> -> vector<16x32xf32>
    %c0_3 = arith.constant 0 : index
    %c0_4 = arith.constant 0 : index
    %8 = vector.load %arg3[%c0_3, %c0_4] : memref<16x32xf32, #tpu.memory_space<vmem>>, vector<16x32xf32>
    tpu.vector_store %arg3[%c0_3, %c0_4], %7 {strides = array<i32>} : memref<16x32xf32, #tpu.memory_space<vmem>>, vector<16x32xf32>,
    return
  }
  func.func @transform_0(%arg0: i32) -> (i32, i32) {
    %c0_i32 = arith.constant 0 : i32
    %c0_i32_0 = arith.constant 0 : i32
    %c0_i32_1 = arith.constant 0 : i32
    return %c0_i32, %c0_i32_0 : i32, i32
  }
  func.func @transform_1(%arg0: i32) -> (i32, i32) {
    %c0_i32 = arith.constant 0 : i32
    %c0_i32_0 = arith.constant 0 : i32
    %c0_i32_1 = arith.constant 0 : i32
    return %c0_i32, %c0_i32_0 : i32, i32
  }
  func.func @transform_2(%arg0: i32) -> (i32, i32) {
    %c0_i32 = arith.constant 0 : i32
    %c0_i32_0 = arith.constant 0 : i32
    %c0_i32_1 = arith.constant 0 : i32
    return %c0_i32, %c0_i32_0 : i32, i32
  }
}

</mosaic_0001>

<bundles_post_ra>
// kernel: tpu_custom_call.1
= control target key start
LH: loop header
LB: loop body
LE: loop exit
PB: predicated region body
PF: predicated region fallthrough
CT: control target
= control target key end

     0   :  { %vm42_vm0 = vcmask 1041408   ;;  %v134_v2 = vmov 0   ;;  %s184_s0 = inlined_call_operand.vmem [shape: s32[16,1], index: 0, kind: input, shape index: {}]   ;;  %s185_s1 = inlined_call_operand.vmem [shape: f32[50,32], index: 1, kind: input, shape index: {}]   ;;  %s186_s2 = inlined_call_operand.hbm [shape: f32[16,32], index: 2, kind: output, shape index: {}]  }
   0x1   :  { %v12_v0 = vld [vmem:[%s184_s0] sm:$0xff]  ;;  %v34_v1 = vld [vmem:[%s185_s1 + $0x30] sm:$0x3]  ;;  %107 = vset.pattern.permute.xlu0 %v134_v2  ;;  %v33_v3 = vld [vmem:[%s185_s1 + $0x28] sm:$0xff] }
   0x2   :  { %92 = vmatpush.msk.msra.mxu0 %vm42_vm0, %v34_v1  ;;  %17 = vperm.xlu0 %107, %v12_v0   ;;  %v32_v4 = vld [vmem:[%s185_s1 + $0x20] sm:$0xff] }
   0x3   :  { %95 = vmatpush.msk.msra.mxu1 %vm42_vm0, %v34_v1 }
   0x4   :  { %7 = vsyncpa [#allocation3], 0  ;;  %56 = vmatpush.msra.mxu0 %v33_v3  ;;  %v31_v5 = vld [vmem:[%s185_s1 + $0x18] sm:$0xff]  ;;  %v30_v6 = vld [vmem:[%s185_s1 + $0x10] sm:$0xff]  ;;  %v14_v10 = vlaneseq  ;;  %vm35_vm1 = vcmask 408576   ;;  %v135_v13 = vmov 0.0  }
   0x5   :  { %96 = vmatpush.msra.mxu1 %v33_v3  ;;  %v13_v7 = vld [vmem:[%s184_s0 + $0x8] sm:$0xff]  ;;  %v28_v9 = vld [vmem:[%s185_s1] sm:$0xff]  ;;  %vm69_vm4 = vcmask 261120   ;;  %s136_s0 = smov [#allocation2]   ;;  %s78_s29 = sshll.u32 %s186_s2, 4  ;;  %s79_s29 = int_to_ptr.hbm [resolvable:$true] %s78_s29 }
   0x6   :  { %57 = vmatpush.msra.mxu0 %v32_v4  ;;  %v29_v8 = vld [vmem:[%s185_s1 + $0x8] sm:$0xff]  ;;  %v15_v11 = vand.u32 127, %v14_v10  ;;  %s76_s27 = sshll.u32 %s136_s0, 4  ;;  %s137_s30 = smov 128   ;;  %s77_s27 = int_to_ptr.vmem [resolvable:$true] %s76_s27 }
   0x7   :  { %97 = vmatpush.msra.mxu1 %v32_v4  ;;  %s138_s3 = smov 8  }
   0x8   :  { %58 = vmatpush.msra.mxu0 %v31_v5 }
   0x9   :  { %98 = vmatpush.msra.mxu1 %v31_v5 }
   0xa   :  { %59 = vmatpush.msra.mxu0 %v30_v6  ;;  %20 = vperm.xlu0 %107, %v13_v7  }
   0xb   :  { %99 = vmatpush.msra.mxu1 %v30_v6 }
   0xc   :  { %60 = vmatpush.msra.mxu0 %v29_v8 }
   0xd   :  { %100 = vmatpush.msra.mxu1 %v29_v8 }
   0xe   :  { %61 = vmatpush.msra.mxu0 %v28_v9 }
   0xf   :  { %101 = vmatpush.msra.mxu1 %v28_v9 }
  0x74   :  { %v18_v12 = vpop.permute.xlu0 %17 }
  0x75   :  { %vm22_vm2 = vcmp.eq.s32.totalorder %v15_v11, %v18_v12 }
  0x76   :  { %v90_v14 = vsel %vm22_vm2, 1.0, %v135_v13 }
  0x77   :  { %93 = vmatmul.msk.f32.vlgmr.msra.gmra.mxu0 %vm35_vm1, %v90_v14 }
  0x7c   :  { %v21_v15 = vpop.permute.xlu0 %20 }
  0x7d   :  { %vm23_vm3 = vcmp.eq.s32.totalorder %v15_v11, %v21_v15 }
  0x7e   :  { %v91_v16 = vsel %vm23_vm3, 1.0, %v135_v13 }
  0x7f   :  { %94 = vmatmul.msk.f32.vlgmr.msra.gmra.mxu1 %vm35_vm1, %v91_v16 }
  0xf4   :  { %v63_v17 = vpop.f32.mrf.mxu0 }
  0xf5   :  { %70 = vst.msk [vmem:[#allocation2] sm:$0xff] %vm69_vm4, %v63_v17 }
  0xfc   :  { %v66_v18 = vpop.f32.mrf.mxu1 }
  0xfd   :  { %71 = vst.msk [vmem:[#allocation2 + $0x8] sm:$0xff] %vm69_vm4, %v66_v18 }
  0xfe   :  { %84 = dma.vmem_to_hbm [thread:$0]  %s77_s27, 256, %s79_s29, [#allocation3], %s137_s30, %s137_s30, %s138_s3  }
  0xff   :  { %132 = dma.done.wait [#allocation3], 256  }
 0x100   :  { %133 = vsyncadd [#allocation3], 4294967040 }
 0x101   :  { %89 = vsyncpa [#allocation3], 1 }

</bundles_post_ra>
